<compile_context>
chip_gen: v5e
topology: v5e:2x2
jax: 0.10.0
libtpu: 0.0.40
codegen_flags: <defaults>
</compile_context>

<pallas_src>
import functools

import jax
import jax.numpy as jnp
from jax.experimental import pallas as pl
from jax.experimental.pallas import tpu as pltpu


def _gclstm_zero_state_kernel(x_ref, w_ref, b_ref, out_ref, *, width):
    """Fused GCLSTM cell (H=C=0 path) + ReLU for one block of packed rows.

    x_ref : [block_rows, width]   f32  (width = pack * d_h; 128 on packed path)
    w_ref : [width, 3*width]      f32  gate projections packed (i, c, o)
    b_ref : [1, 3*width]          f32  pre-summed cheb bias + gate bias
    out   : [block_rows, width]   f32
    """
    pre = jnp.dot(x_ref[...], w_ref[...],
                  preferred_element_type=jnp.float32,
                  precision=jax.lax.Precision.HIGHEST) + b_ref[...]
    # On the packed path these are whole-vreg 128-lane-aligned slices.
    i_g = jax.nn.sigmoid(pre[:, :width])
    c_t = jnp.tanh(pre[:, width:2 * width])
    o_g = jax.nn.sigmoid(pre[:, 2 * width:])
    # Forget gate never materialized: it only multiplies C == 0 on this path.
    h_new = o_g * jnp.tanh(i_g * c_t)
    out_ref[...] = jnp.maximum(h_new, 0.0)        # F.relu in TgtGCLstm._step


def prepare_gclstm_params(W, Theta, cheb_b, gate_b):
    """One-time parameter packing (hoisted out of the per-step forward).

    Only gates (i, c, o) are kept: the forget gate multiplies C == 0 on the
    H=None/C=None call path, and the Chebyshev weights Theta are numerically
    dead for the same reason (every T_k(L_hat) @ H term is zero when H == 0);
    ChebConv contributes only its bias, folded into `b`.

    When 128 % d_h == 0, `pack = 128 // d_h` nodes are packed per kernel row
    and the weights become block-diagonal so every kernel load / matmul /
    activation / store is 128-lane dense.
    """
    del Theta  # numerically dead when H=None / C=None
    d_h = W.shape[-1]
    gates = (0, 2, 3)  # i, c, o
    pack = 128 // d_h if (d_h <= 128 and 128 % d_h == 0) else 1
    if pack > 1:
        eye = jnp.eye(pack, dtype=jnp.float32)
        w = jnp.concatenate(
            [jnp.kron(eye, W[g].astype(jnp.float32)) for g in gates], axis=1)
        b = jnp.concatenate(
            [jnp.tile((cheb_b[g] + gate_b[g]).reshape(1, d_h).astype(jnp.float32),
                      (1, pack))
             for g in gates], axis=1)
    else:
        w = jnp.concatenate([W[g].astype(jnp.float32) for g in gates], axis=1)
        b = jnp.concatenate(
            [(cheb_b[g] + gate_b[g]).reshape(1, d_h).astype(jnp.float32)
             for g in gates], axis=1)
    return {"w": w, "b": b, "d_h": d_h, "pack": pack}


def _choose_block_rows(R, max_rows=2048):
    """Pick the row-block size for the packed grid.

    Large blocks (up to 2048 packed rows = 8192 nodes, ~2 MB/step) amortize the
    ~0.35 us per-grid-step pipeline overhead; >=2 steps (when R > 16) lets the
    "parallel" axis shard across v7x's two TensorCores.  Prefer a multiple of 8
    that divides R so the ragged tail needs no padding pass over x.
    """
    if R <= 16:
        return R                       # single full-array block
    target = min(max_rows, max(8, ((R + 1) // 2) // 8 * 8))
    for cand in range(target, max(7, target // 4), -8):
        if R % cand == 0:
            return cand
    return target                      # fall back to padding the ragged tail


def tgt_gclstm_forward(H_K_prev, edgelists, params, *, block_rows=None):
    """Mirrors TgtGCLstm.forward.

    Only H_K_prev[0] is consumed (the torch loop returns on its first
    iteration) and, because GCLSTM is called with H=None / C=None, the edge
    lists have no effect on the output — accepted for interface parity only.
    `params` comes from prepare_gclstm_params (computed once, reused per step).
    """
    del edgelists  # numerically dead when H=None / C=None

    x = H_K_prev[0]                                   # [N, d_h] f32 (no cast)
    N, d_h = x.shape
    pack = params["pack"]
    width = pack * d_h

    # Pack `pack` nodes per row along lanes: metadata-only when N % pack == 0.
    pad_nodes = (-N) % pack
    if pad_nodes:
        x = jnp.pad(x, ((0, pad_nodes), (0, 0)))      # fallback only
    R = (N + pad_nodes) // pack
    xr = x.reshape(R, width) if pack > 1 else x

    if block_rows is None:
        block_rows = _choose_block_rows(R)
    pad_r = (-R) % block_rows
    if pad_r:
        xr = jnp.pad(xr, ((0, pad_r), (0, 0)))        # fallback only
    Rp = R + pad_r
    grid = (Rp // block_rows,)

    grid_spec = pltpu.PrefetchScalarGridSpec(
        num_scalar_prefetch=0,
        grid=grid,
        in_specs=[
            pl.BlockSpec((block_rows, width), lambda i: (i, 0)),   # x rows
            pl.BlockSpec(params["w"].shape, lambda i: (0, 0)),     # W (resident)
            pl.BlockSpec(params["b"].shape, lambda i: (0, 0)),     # bias (resident)
        ],
        out_specs=pl.BlockSpec((block_rows, width), lambda i: (i, 0)),
    )

    out = pl.pallas_call(
        functools.partial(_gclstm_zero_state_kernel, width=width),
        out_shape=jax.ShapeDtypeStruct((Rp, width), jnp.float32),
        grid_spec=grid_spec,
        compiler_params=pltpu.CompilerParams(
            dimension_semantics=("parallel",)),
    )(xr, params["w"], params["b"])

    h = out.reshape(Rp * pack, d_h)                   # metadata-only reshape
    if Rp * pack != N:
        h = h[:N]                                     # drop padded rows
    return h[None]                   # torch.unsqueeze(H_t, 0) -> (1, N, d_h)


# ---------------------------------------------------------------------------
# Pure-JAX reference of the FULL GCLSTM math (Laplacian + Chebyshev recursion
# with H=C=0), used only to verify that the simplified kernel is exact.
# ---------------------------------------------------------------------------
def build_scaled_laplacian(edge_index, edge_weight, num_nodes):
    """PyG ChebConv 'sym' normalization with default lambda_max = 2.0:
       L_hat = (2/2) * (I - D^-1/2 A D^-1/2) - I = -D^-1/2 A D^-1/2."""
    row, col = edge_index[0], edge_index[1]
    a = jnp.zeros((num_nodes, num_nodes), jnp.float32).at[row, col].add(edge_weight)
    deg = jnp.zeros((num_nodes,), jnp.float32).at[row].add(edge_weight)
    d_inv_sqrt = jnp.where(deg > 0, 1.0 / jnp.sqrt(deg), 0.0)
    return -(d_inv_sqrt[:, None] * a * d_inv_sqrt[None, :])


def _reference_forward(x, lhat, W, Theta, cheb_b, gate_b, K):
    h = jnp.zeros_like(x)
    c = jnp.zeros_like(x)

    def cheb(g):
        txs = [h]
        if K > 1:
            txs.append(lhat @ h)
            for _ in range(2, K):
                txs.append(2.0 * (lhat @ txs[-1]) - txs[-2])
        acc = sum(txs[k] @ Theta[g * K + k] for k in range(K))
        return acc + cheb_b[g]

    def pre(g):
        return x @ W[g] + cheb(g) + gate_b[g]

    i = jax.nn.sigmoid(pre(0))
    f = jax.nn.sigmoid(pre(1))
    t = jnp.tanh(pre(2))
    c_new = f * c + i * t
    o = jax.nn.sigmoid(pre(3))
    return jnp.maximum(o * jnp.tanh(c_new), 0.0)


if __name__ == "__main__":
    N, d_h, K = 16, 32, 3      # N nodes, hidden dim, nb_spectral_supports
    K_hist = 4                 # length of H_K_prev history (only [0] is used)
    E = 48                     # number of edges

    key = jax.random.PRNGKey(0)
    keys = jax.random.split(key, 8)

    H_K_prev = jax.random.normal(keys[0], (K_hist, N, d_h), jnp.float32)
    src = jax.random.randint(keys[1], (E,), 0, N)
    dst = jax.random.randint(keys[2], (E,), 0, N)
    edge_index = jnp.stack([src, dst]).astype(jnp.int32)
    edgelists = [edge_index for _ in range(K_hist)]

    # Shapes follow GCLSTM.__init__:
    #   W_g : [d_h, d_h], b_g : [1, d_h], ChebConv_g: K x [d_h, d_h] + bias[d_h]
    W = 0.1 * jax.random.normal(keys[3], (4, d_h, d_h), jnp.float32)
    Theta = 0.1 * jax.random.normal(keys[4], (4 * K, d_h, d_h), jnp.float32)
    cheb_b = 0.05 * jax.random.normal(keys[5], (4, 1, d_h), jnp.float32)
    gate_b = 0.05 * jax.random.normal(keys[6], (4, 1, d_h), jnp.float32)

    # One-time parameter packing, reused across every forward step.
    params = prepare_gclstm_params(W, Theta, cheb_b, gate_b)

    out = tgt_gclstm_forward(H_K_prev, edgelists, params)
    out = jax.block_until_ready(out)
    assert out.shape == (1, N, d_h), out.shape

    # Verify against the full GCLSTM math (including the — identically zero —
    # Chebyshev propagation and forget-gate terms).
    lhat = build_scaled_laplacian(
        edgelists[0], jnp.ones((edgelists[0].shape[1],), jnp.float32), N)
    ref = _reference_forward(H_K_prev[0], lhat, W, Theta, cheb_b, gate_b, K)
    assert jnp.allclose(out[0], ref, atol=5e-3, rtol=5e-3), "mismatch vs reference"

    print("KERNEL_OK")
</pallas_src>

<mosaic_0001>
module attributes {stable_mosaic.version = 11 : i64} {
  func.func @_gclstm_zero_state_kernel(%arg0: i32, %arg1: memref<4x128xf32, #tpu.memory_space<vmem>>, %arg2: memref<128x384xf32, #tpu.memory_space<vmem>>, %arg3: memref<1x384xf32, #tpu.memory_space<vmem>>, %arg4: memref<4x128xf32, #tpu.memory_space<vmem>>) attributes {dimension_semantics = [#tpu.dimension_semantics<parallel>], iteration_bounds = array<i64: 1>, scalar_prefetch = 0 : i64, scratch_operands = 0 : i64, tpu.core_type = #tpu.core_type<tc>, window_params = [{transform_indices = @transform_0, window_bounds = array<i64: 4, 128>}, {pipeline_mode = #tpu.pipeline_mode<synchronous>, transform_indices = @transform_1, window_bounds = array<i64: 128, 384>}, {pipeline_mode = #tpu.pipeline_mode<synchronous>, transform_indices = @transform_2, window_bounds = array<i64: 1, 384>}, {transform_indices = @transform_3, window_bounds = array<i64: 4, 128>}]} {
    %c0 = arith.constant 0 : index
    %c0_0 = arith.constant 0 : index
    %0 = vector.load %arg1[%c0, %c0_0] : memref<4x128xf32, #tpu.memory_space<vmem>>, vector<4x128xf32>
    %c0_1 = arith.constant 0 : index
    %c0_2 = arith.constant 0 : index
    %1 = vector.load %arg2[%c0_1, %c0_2] : memref<128x384xf32, #tpu.memory_space<vmem>>, vector<128x384xf32>
    %cst = arith.constant dense<0.000000e+00> : vector<4x384xf32>
    %2 = tpu.matmul %0, %1, %cst {dimension_numbers = #tpu.dot_dimension_numbers<[1], [0], [0], [1], [0, 0, 1, 1], [], []>, precision = #tpu.contract_precision<fp32>} : vector<4x128xf32>, vector<128x384xf32>, vector<4x384xf32> -> vector<4x384xf32>
    %c0_3 = arith.constant 0 : index
    %c0_4 = arith.constant 0 : index
    %3 = vector.load %arg3[%c0_3, %c0_4] : memref<1x384xf32, #tpu.memory_space<vmem>>, vector<1x384xf32>
    %4 = vector.broadcast %3 : vector<1x384xf32> to vector<4x384xf32>
    %5 = arith.addf %2, %4 : vector<4x384xf32>
    %6 = vector.extract_strided_slice %5 {offsets = [0, 0], sizes = [4, 128], strides = [1, 1]} : vector<4x384xf32> to vector<4x128xf32>
    %7 = arith.negf %6 : vector<4x128xf32>
    %8 = math.exp %7 : vector<4x128xf32>
    %cst_5 = arith.constant 1.000000e+00 : f32
    %9 = vector.broadcast %cst_5 : f32 to vector<4x128xf32>
    %10 = arith.addf %9, %8 : vector<4x128xf32>
    %11 = arith.divf %9, %10 : vector<4x128xf32>
    %12 = vector.extract_strided_slice %5 {offsets = [0, 128], sizes = [4, 128], strides = [1, 1]} : vector<4x384xf32> to vector<4x128xf32>
    %13 = math.tanh %12 : vector<4x128xf32>
    %14 = vector.extract_strided_slice %5 {offsets = [0, 256], sizes = [4, 128], strides = [1, 1]} : vector<4x384xf32> to vector<4x128xf32>
    %15 = arith.negf %14 : vector<4x128xf32>
    %16 = math.exp %15 : vector<4x128xf32>
    %cst_6 = arith.constant 1.000000e+00 : f32
    %17 = vector.broadcast %cst_6 : f32 to vector<4x128xf32>
    %18 = arith.addf %17, %16 : vector<4x128xf32>
    %19 = arith.divf %17, %18 : vector<4x128xf32>
    %20 = arith.mulf %11, %13 : vector<4x128xf32>
    %21 = math.tanh %20 : vector<4x128xf32>
    %22 = arith.mulf %19, %21 : vector<4x128xf32>
    %cst_7 = arith.constant 0.000000e+00 : f32
    %23 = vector.broadcast %cst_7 : f32 to vector<4x128xf32>
    %24 = arith.maximumf %22, %23 : vector<4x128xf32>
    %c0_8 = arith.constant 0 : index
    %c0_9 = arith.constant 0 : index
    %25 = vector.load %arg4[%c0_8, %c0_9] : memref<4x128xf32, #tpu.memory_space<vmem>>, vector<4x128xf32>
    tpu.vector_store %arg4[%c0_8, %c0_9], %24 {strides = array<i32>} : memref<4x128xf32, #tpu.memory_space<vmem>>, vector<4x128xf32>,
    return
  }
  func.func @transform_0(%arg0: i32) -> (i32, i32) {
    %c0_i32 = arith.constant 0 : i32
    %c0_i32_0 = arith.constant 0 : i32
    return %arg0, %c0_i32 : i32, i32
  }
  func.func @transform_1(%arg0: i32) -> (i32, i32) {
    %c0_i32 = arith.constant 0 : i32
    %c0_i32_0 = arith.constant 0 : i32
    %c0_i32_1 = arith.constant 0 : i32
    return %c0_i32, %c0_i32_0 : i32, i32
  }
  func.func @transform_2(%arg0: i32) -> (i32, i32) {
    %c0_i32 = arith.constant 0 : i32
    %c0_i32_0 = arith.constant 0 : i32
    %c0_i32_1 = arith.constant 0 : i32
    return %c0_i32, %c0_i32_0 : i32, i32
  }
  func.func @transform_3(%arg0: i32) -> (i32, i32) {
    %c0_i32 = arith.constant 0 : i32
    %c0_i32_0 = arith.constant 0 : i32
    return %arg0, %c0_i32 : i32, i32
  }
}

</mosaic_0001>

<bundles_post_ra>
// kernel: tpu_custom_call.1
= control target key start
LH: loop header
LB: loop body
LE: loop exit
PB: predicated region body
PF: predicated region fallthrough
CT: control target
= control target key end

     0   :  { %8 = vsyncpa [#allocation3], 0  ;;  %s2110_s0 = inlined_call_operand.hbm [shape: f32[4,128], index: 0, kind: input, shape index: {}]   ;;  %s2111_s1 = inlined_call_operand.hbm [shape: f32[128,384], index: 1, kind: input, shape index: {}]   ;;  %s2112_s2 = inlined_call_operand.hbm [shape: f32[1,384], index: 2, kind: input, shape index: {}]   ;;  %s2113_s3 = inlined_call_operand.hbm [shape: f32[4,128], index: 3, kind: output, shape index: {}]  }
   0x1   :  { %9 = vsyncpa [#allocation6], 0  ;;  %s26_s14 = sshll.u32 %s2111_s1, 4  ;;  %s27_s14 = int_to_ptr.hbm [resolvable:$true] %s26_s14 }
   0x2   :  { %10 = vsyncpa [#allocation4], 0  ;;  %s1322_s15 = smov [#allocation5]   ;;  %s16_s19 = sshll.u32 %s2110_s0, 4  ;;  %s17_s19 = int_to_ptr.hbm [resolvable:$true] %s16_s19 }
   0x3   :  { %s28_s16 = sshll.u32 %s1322_s15, 4  ;;  %s1323_s20 = smov 384   ;;  %s29_s16 = int_to_ptr.vmem [resolvable:$true] %s28_s16 }
   0x4   :  { %s1324_s21 = smov 24   ;;  %s1325_s22 = smov [#allocation2]  }
   0x5   :  { %34 = dma.hbm_to_vmem [thread:$0]  %s27_s14, 6144, %s29_s16, [#allocation6], %s1323_s20, %s1323_s20, %s1324_s21  }
   0x6   :  { %s18_s23 = sshll.u32 %s1325_s22, 4  ;;  %s40_s26 = sshll.u32 %s2112_s2, 4  ;;  %s19_s23 = int_to_ptr.vmem [resolvable:$true] %s18_s23  ;;  %s41_s26 = int_to_ptr.hbm [resolvable:$true] %s40_s26 }
   0x7   :  { %21 = dma.hbm_to_vmem [thread:$0]  %s17_s19, 64, %s19_s23, [#allocation3]  }
   0x8   :  { %s1326_s1 = smov [#allocation7]  }
   0x9   :  { %s42_s27 = sshll.u32 %s1326_s1, 4  ;;  %s43_s27 = int_to_ptr.vmem [resolvable:$true] %s42_s27 }
   0xa   :  { %45 = dma.hbm_to_vmem [thread:$0]  %s41_s26, 48, %s43_s27, [#allocation6]  }
   0xb   :  { %1316 = dma.done.wait [#allocation3], 64  }
   0xc   :  { %1317 = vsyncadd [#allocation3], 4294967232 }
   0xd   :  { %1318 = dma.done.wait [#allocation6], 6192  }
   0xe   :  { %1319 = vsyncadd [#allocation6], 4294961104  ;;  %v104_v0 = vld [vmem:[#allocation5 + $0x168] sm:$0xff]  ;;  %v101_v1 = vld [vmem:[#allocation5 + $0x150] sm:$0xff]  ;;  %s1327_s0 = smov [#allocation8]   ;;  %s1189_s30 = sshll.u32 %s2113_s3, 4  ;;  %s1190_s30 = int_to_ptr.hbm [resolvable:$true] %s1189_s30 }
   0xf   :  { %v98_v2 = vld [vmem:[#allocation5 + $0x138] sm:$0xff]  ;;  %v1357_v3 = vand.u32 4294901760, %v104_v0  ;;  %v1359_v4 = vand.u32 4294901760, %v101_v1  ;;  %v95_v6 = vld [vmem:[#allocation5 + $0x120] sm:$0xff]  ;;  %v92_v7 = vld [vmem:[#allocation5 + $0x108] sm:$0xff]  ;;  %s1187_s2 = sshll.u32 %s1327_s0, 4  ;;  %s1188_s2 = int_to_ptr.vmem [resolvable:$true] %s1187_s2 }
  0x10   :  { %v1361_v5 = vand.u32 4294901760, %v98_v2  ;;  %v89_v8 = vld [vmem:[#allocation5 + $0xf0] sm:$0xff]  ;;  %v1363_v9 = vand.u32 4294901760, %v95_v6  ;;  %v1365_v10 = vand.u32 4294901760, %v92_v7  ;;  %v86_v12 = vld [vmem:[#allocation5 + $0xd8] sm:$0xff]  ;;  %v83_v13 = vld [vmem:[#allocation5 + $0xc0] sm:$0xff] }
  0x11   :  { %v1367_v11 = vand.u32 4294901760, %v89_v8  ;;  %v1370_v14 = vsub.f32 %v104_v0, %v1357_v3  ;;  %116 = vmatpush.msra.mxu0 %v1357_v3  ;;  %v1374_v15 = vsub.f32 %v101_v1, %v1359_v4  ;;  %312 = vmatpush.msra.mxu3 %v1357_v3  ;;  %v1380_v17 = vand.u32 4294901760, %v86_v12  ;;  %v80_v25 = vld [vmem:[#allocation5 + $0xa8] sm:$0xff]  ;;  %v77_v34 = vld [vmem:[#allocation5 + $0x90] sm:$0xff]  ;;  %v74_v35 = vld [vmem:[#allocation5 + $0x78] sm:$0xff] }
  0x12   :  { %v1378_v16 = vsub.f32 %v98_v2, %v1361_v5  ;;  %v1383_v18 = vsub.f32 %v95_v6, %v1363_v9  ;;  %v1386_v19 = vsub.f32 %v92_v7, %v1365_v10  ;;  %v1396_v24 = vand.u32 4294901760, %v83_v13  ;;  %v71_v40 = vld [vmem:[#allocation5 + $0x60] sm:$0xff]  ;;  %v68_v48 = vld [vmem:[#allocation5 + $0x48] sm:$0xff]  ;;  %v65_v53 = vld [vmem:[#allocation5 + $0x30] sm:$0xff] }
  0x13   :  { %v1389_v20 = vsub.f32 %v89_v8, %v1367_v11  ;;  %259 = vmatpush.msra.mxu2 %v1370_v14  ;;  %118 = vmatpush.msra.mxu0 %v1359_v4  ;;  %v2128_v21 = vand.u32 4294901760, %v1370_v14  ;;  %v2127_v22 = vand.u32 4294901760, %v1374_v15  ;;  %v1402_v28 = vsub.f32 %v86_v12, %v1380_v17  ;;  %v62_v59 = vld [vmem:[#allocation5 + $0x18] sm:$0xff]  ;;  %v105_v60 = vld [vmem:[#allocation5 + $0x170] sm:$0xff]  ;;  %v59_v6 = vld [vmem:[#allocation5] sm:$0xff] }
  0x14   :  { %v2126_v23 = vand.u32 4294901760, %v1378_v16  ;;  %314 = vmatpush.msra.mxu3 %v1359_v4  ;;  %v2123_v26 = vand.u32 4294901760, %v1383_v18  ;;  %v2122_v27 = vand.u32 4294901760, %v1386_v19  ;;  %v1417_v33 = vand.u32 4294901760, %v80_v25  ;;  %v102_v63 = vld [vmem:[#allocation5 + $0x158] sm:$0xff] }
  0x15   :  { %262 = vmatpush.msra.mxu2 %v1374_v15  ;;  %v159_v29 = vsub.f32 %v1370_v14, %v2128_v21  ;;  %120 = vmatpush.msra.mxu0 %v1361_v5  ;;  %v165_v30 = vsub.f32 %v1374_v15, %v2127_v22  ;;  %v2120_v32 = vand.u32 4294901760, %v1389_v20  ;;  %v1425_v39 = vsub.f32 %v83_v13, %v1396_v24  ;;  %v99_v13 = vld [vmem:[#allocation5 + $0x140] sm:$0xff] }
  0x16   :  { %v171_v31 = vsub.f32 %v1378_v16, %v2126_v23  ;;  %316 = vmatpush.msra.mxu3 %v1361_v5  ;;  %v177_v38 = vsub.f32 %v1383_v18, %v2123_v26  ;;  %v183_v41 = vsub.f32 %v1386_v19, %v2122_v27  ;;  %v2119_v42 = vand.u32 4294901760, %v1402_v28  ;;  %v81_v26 = vld [vmem:[#allocation5 + $0xb0] sm:$0xff] }
  0x17   :  { %v160_v36 = vand.u32 4294901760, %v159_v29  ;;  %265 = vmatpush.msra.mxu2 %v1378_v16  ;;  %v166_v37 = vand.u32 4294901760, %v165_v30  ;;  %122 = vmatpush.msra.mxu0 %v1363_v9  ;;  %v1434_v44 = vsub.f32 %v80_v25, %v1417_v33  ;;  %v1436_v45 = vand.u32 4294901760, %v77_v34 }
  0x18   :  { %318 = vmatpush.msra.mxu3 %v1363_v9  ;;  %v172_v43 = vand.u32 4294901760, %v171_v31  ;;  %v1438_v46 = vand.u32 4294901760, %v74_v35  ;;  %v1442_v47 = vand.u32 4294901760, %v71_v40  ;;  %v178_v49 = vand.u32 4294901760, %v177_v38 }
  0x19   :  { %161 = vmatpush.msra.mxu1 %v160_v36  ;;  %268 = vmatpush.msra.mxu2 %v1383_v18  ;;  %v189_v50 = vsub.f32 %v1389_v20, %v2120_v32  ;;  %v2118_v51 = vand.u32 4294901760, %v1425_v39  ;;  %v1450_v52 = vsub.f32 %v77_v34, %v1436_v45  ;;  %v195_v54 = vsub.f32 %v1402_v28, %v2119_v42  ;;  %v84_v32 = vld [vmem:[#allocation5 + $0xc8] sm:$0xff] }
  0x1a   :  { %124 = vmatpush.msra.mxu0 %v1365_v10  ;;  %320 = vmatpush.msra.mxu3 %v1365_v10  ;;  %v184_v55 = vand.u32 4294901760, %v183_v41  ;;  %v2117_v56 = vand.u32 4294901760, %v1434_v44  ;;  %v1460_v57 = vsub.f32 %v74_v35, %v1438_v46  ;;  %v1462_v58 = vand.u32 4294901760, %v68_v48 }
  0x1b   :  { %167 = vmatpush.msra.mxu1 %v166_v37  ;;  %271 = vmatpush.msra.mxu2 %v1386_v19  ;;  %v1467_v61 = vsub.f32 %v71_v40, %v1442_v47  ;;  %v1469_v62 = vand.u32 4294901760, %v65_v53  ;;  %v190_v0 = vand.u32 4294901760, %v189_v50  ;;  %v201_v1 = vsub.f32 %v1425_v39, %v2118_v51  ;;  %v96_v37 = vld [vmem:[#allocation5 + $0x128] sm:$0xff] }
  0x1c   :  { %126 = vmatpush.msra.mxu0 %v1367_v11  ;;  %322 = vmatpush.msra.mxu3 %v1367_v11  ;;  %v2115_v2 = vand.u32 4294901760, %v1450_v52  ;;  %v196_v7 = vand.u32 4294901760, %v195_v54  ;;  %v1478_v8 = vand.u32 4294901760, %v62_v59  ;;  %v1480_v12 = vand.u32 4294901760, %v105_v60 }
  0x1d   :  { %173 = vmatpush.msra.mxu1 %v172_v43  ;;  %274 = vmatpush.msra.mxu2 %v1389_v20  ;;  %v207_v25 = vsub.f32 %v1434_v44, %v2117_v56  ;;  %v2114_v29 = vand.u32 4294901760, %v1460_v57  ;;  %v1488_v30 = vsub.f32 %v68_v48, %v1462_v58  ;;  %v1490_v31 = vand.u32 4294901760, %v102_v63  ;;  %v93_v48 = vld [vmem:[#allocation5 + $0x110] sm:$0xff] }
  0x1e   :  { %128 = vmatpush.msra.mxu0 %v1380_v17  ;;  %324 = vmatpush.msra.mxu3 %v1380_v17  ;;  %2142 = vst [vmem:[#allocation12_spill] sm:$0xff] %v1478_v8  ;;  %v2116_v34 = vand.u32 4294901760, %v1467_v61  ;;  %v1496_v35 = vsub.f32 %v65_v53, %v1469_v62  ;;  %v1498_v36 = vand.u32 4294901760, %v59_v6  ;;  %v202_v38 = vand.u32 4294901760, %v201_v1  ;;  %v90_v1 = vld [vmem:[#allocation5 + $0xf8] sm:$0xff] }
  0x1f   :  { %179 = vmatpush.msra.mxu1 %v178_v49  ;;  %277 = vmatpush.msra.mxu2 %v1402_v28  ;;  %v213_v40 = vsub.f32 %v1450_v52, %v2115_v2  ;;  %v1505_v41 = vsub.f32 %v105_v60, %v1480_v12  ;;  %v1507_v43 = vand.u32 4294901760, %v99_v13  ;;  %v1512_v49 = vsub.f32 %v62_v59, %v1478_v8 }
  0x20   :  { %130 = vmatpush.msra.mxu0 %v1396_v24  ;;  %326 = vmatpush.msra.mxu3 %v1396_v24  ;;  %2143 = vst [vmem:[#allocation13_spill] sm:$0xff] %v1498_v36  ;;  %v1515_v50 = vsub.f32 %v102_v63, %v1490_v31  ;;  %v208_v53 = vand.u32 4294901760, %v207_v25  ;;  %v219_v54 = vsub.f32 %v1460_v57, %v2114_v29  ;;  %v1522_v60 = vand.u32 4294901760, %v96_v37 }
  0x21   :  { %185 = vmatpush.msra.mxu1 %v184_v55  ;;  %280 = vmatpush.msra.mxu2 %v1425_v39  ;;  %v2121_v55 = vand.u32 4294901760, %v1488_v30  ;;  %v225_v59 = vsub.f32 %v1467_v61, %v2116_v34  ;;  %v2125_v63 = vand.u32 4294901760, %v1496_v35  ;;  %v1534_v25 = vsub.f32 %v59_v6, %v1498_v36 }
  0x22   :  { %132 = vmatpush.msra.mxu0 %v1417_v33  ;;  %328 = vmatpush.msra.mxu3 %v1417_v33  ;;  %2144 = vst [vmem:[#allocation14_spill] sm:$0xff] %v1515_v50  ;;  %v2124_v29 = vand.u32 4294901760, %v1505_v41  ;;  %v1538_v2 = vsub.f32 %v99_v13, %v1507_v43  ;;  %v2129_v34 = vand.u32 4294901760, %v1512_v49  ;;  %v2130_v56 = vand.u32 4294901760, %v1515_v50 }
  0x23   :  { %191 = vmatpush.msra.mxu1 %v190_v0  ;;  %283 = vmatpush.msra.mxu2 %v1434_v44  ;;  %v1530_v0 = vand.u32 4294901760, %v93_v48  ;;  %v231_v6 = vsub.f32 %v1488_v30, %v2121_v55  ;;  %v1549_v13 = vsub.f32 %v96_v37, %v1522_v60  ;;  %v1551_v51 = vand.u32 4294901760, %v90_v1 }
  0x24   :  { %134 = vmatpush.msra.mxu0 %v1436_v45  ;;  %330 = vmatpush.msra.mxu3 %v1436_v45  ;;  %2145 = vst [vmem:[#allocation15_spill] sm:$0xff] %v1538_v2  ;;  %v226_v42 = vand.u32 4294901760, %v225_v59  ;;  %v500_v37 = vsub.f32 %v1505_v41, %v2124_v29  ;;  %v2133_v55 = vand.u32 4294901760, %v1534_v25  ;;  %v1582_v22 = vand.u32 4294901760, %v84_v32 }
  0x25   :  { %197 = vmatpush.msra.mxu1 %v196_v7  ;;  %286 = vmatpush.msra.mxu2 %v1450_v52  ;;  %v214_v7 = vand.u32 4294901760, %v213_v40  ;;  %v220_v40 = vand.u32 4294901760, %v219_v54  ;;  %2146 = vst [vmem:[#allocation16_spill] sm:$0xff] %v1549_v13  ;;  %v1559_v54 = vsub.f32 %v93_v48, %v1530_v0  ;;  %v243_v48 = vsub.f32 %v1512_v49, %v2129_v34 }
  0x26   :  { %136 = vmatpush.msra.mxu0 %v1438_v46  ;;  %332 = vmatpush.msra.mxu3 %v1438_v46  ;;  %v232_v29 = vand.u32 4294901760, %v231_v6  ;;  %v1580_v23 = vsub.f32 %v90_v1, %v1551_v51  ;;  %v1587_v59 = vand.u32 4294901760, %v81_v26  ;;  %v501_v6 = vand.u32 4294901760, %v500_v37 }
  0x27   :  { %203 = vmatpush.msra.mxu1 %v202_v38  ;;  %289 = vmatpush.msra.mxu2 %v1460_v57  ;;  %v87_v38 = vld [vmem:[#allocation5 + $0xe0] sm:$0xff]  ;;  %v249_v1 = vsub.f32 %v1534_v25, %v2133_v55  ;;  %v244_v34 = vand.u32 4294901760, %v243_v48  ;;  %v2148_v37 = vand.u32 4294901760, %v1549_v13  ;;  %v2149_v48 = vand.u32 4294901760, %v1370_v14 }
  0x28   :  { %138 = vmatpush.msra.mxu0 %v1442_v47  ;;  %334 = vmatpush.msra.mxu3 %v1442_v47  ;;  %v1567_v27 = vand.u32 4294901760, %v87_v38  ;;  %v2151_v14 = vand.u32 4294901760, %v1374_v15 }
  0x29   :  { %209 = vmatpush.msra.mxu1 %v208_v53  ;;  %292 = vmatpush.msra.mxu2 %v1467_v61  ;;  %v237_v53 = vsub.f32 %v1496_v35, %v2125_v63  ;;  %v518_v55 = vsub.f32 %v1549_v13, %v2148_v37  ;;  %v250_v37 = vand.u32 4294901760, %v249_v1  ;;  %v2153_v1 = vand.u32 4294901760, %v1378_v16 }
  0x2a   :  { %140 = vmatpush.msra.mxu0 %v1462_v58  ;;  %336 = vmatpush.msra.mxu3 %v1462_v58  ;;  %v2154_v16 = vand.u32 4294901760, %v1383_v18  ;;  %v66_v18 = vld [vmem:[#allocation5 + $0x38] sm:$0xff] }
  0x2b   :  { %215 = vmatpush.msra.mxu1 %v214_v7  ;;  %295 = vmatpush.msra.mxu2 %v1488_v30  ;;  %v506_v7 = vsub.f32 %v1515_v50, %v2130_v56  ;;  %v238_v21 = vand.u32 4294901760, %v237_v53  ;;  %v2147_v56 = vand.u32 4294901760, %v1538_v2  ;;  %v1597_v53 = vsub.f32 %v87_v38, %v1567_v27  ;;  %v75_v50 = vld [vmem:[#allocation5 + $0x80] sm:$0xff] }
  0x2c   :  { %142 = vmatpush.msra.mxu0 %v1469_v62  ;;  %338 = vmatpush.msra.mxu3 %v1469_v62  ;;  %v1621_v13 = vand.u32 4294901760, %v75_v50 }
  0x2d   :  { %221 = vmatpush.msra.mxu1 %v220_v40  ;;  %298 = vmatpush.msra.mxu2 %v1496_v35  ;;  %v78_v40 = vld [vmem:[#allocation5 + $0x98] sm:$0xff]  ;;  %v512_v63 = vsub.f32 %v1538_v2, %v2147_v56  ;;  %v1607_v56 = vsub.f32 %v84_v32, %v1582_v22  ;;  %v1618_v2 = vsub.f32 %v81_v26, %v1587_v59  ;;  %v535_v32 = vand.u32 4294901760, %v1597_v53 }
  0x2e   :  { %144 = vmatpush.msra.mxu0 %v1478_v8  ;;  %340 = vmatpush.msra.mxu3 %v1478_v8  ;;  %v1609_v38 = vand.u32 4294901760, %v78_v40  ;;  %v2152_v26 = vand.u32 4294901760, %v1580_v23 }
  0x2f   :  { %227 = vmatpush.msra.mxu1 %v226_v42  ;;  %301 = vmatpush.msra.mxu2 %v1512_v49  ;;  %v507_v42 = vand.u32 4294901760, %v506_v7  ;;  %v513_v8 = vand.u32 4294901760, %v512_v63  ;;  %v2141_v63 = vand.u32 4294901760, %v1607_v56 }
  0x30   :  { %146 = vmatpush.msra.mxu0 %v1498_v36  ;;  %342 = vmatpush.msra.mxu3 %v1498_v36  ;;  %v58_v36 = vld [vmem:[#allocation2] sm:$0xf] }
  0x31   :  { %233 = vmatpush.msra.mxu1 %v232_v29  ;;  %304 = vmatpush.msra.mxu2 %v1534_v25  ;;  %v2150_v29 = vand.u32 4294901760, %v1559_v54 }
  0x32   :  { %353 = vmatpush.msrb.mxu0 %v2149_v48  ;;  %502 = vmatpush.msrb.mxu3 %v501_v6  ;;  %v72_v48 = vld [vmem:[#allocation5 + $0x68] sm:$0xff]  ;;  %v1631_v6 = vsub.f32 %v78_v40, %v1609_v38  ;;  %v1645_v40 = vand.u32 4294901760, %v58_v36 }
  0x33   :  { %457 = vmatpush.msrb.mxu2 %v1480_v12  ;;  %v524_v7 = vsub.f32 %v1559_v54, %v2150_v29  ;;  %239 = vmatpush.msra.mxu1 %v238_v21  ;;  %v519_v29 = vand.u32 4294901760, %v518_v55  ;;  %v530_v21 = vsub.f32 %v1580_v23, %v2152_v26  ;;  %v1640_v55 = vand.u32 4294901760, %v72_v48  ;;  %v69_v26 = vld [vmem:[#allocation5 + $0x50] sm:$0xff] }
  0x34   :  { %357 = vmatpush.msrb.mxu0 %v2151_v14  ;;  %508 = vmatpush.msrb.mxu3 %v507_v42  ;;  %v2140_v14 = vand.u32 4294901760, %v1618_v2  ;;  %v1643_v42 = vsub.f32 %v75_v50, %v1621_v13  ;;  %v1660_v50 = vand.u32 4294901760, %v69_v26 }
  0x35   :  { %459 = vmatpush.msrb.mxu2 %v1490_v31  ;;  %245 = vmatpush.msra.mxu1 %v244_v34  ;;  %v525_v15 = vand.u32 4294901760, %v524_v7  ;;  %v536_v34 = vsub.f32 %v1597_v53, %v535_v32  ;;  %v542_v7 = vsub.f32 %v1607_v56, %v2141_v63  ;;  %v2156_v63 = vand.u32 4294901760, %v1389_v20 }
  0x36   :  { %361 = vmatpush.msrb.mxu0 %v2153_v1  ;;  %514 = vmatpush.msrb.mxu3 %v513_v8  ;;  %v531_v8 = vand.u32 4294901760, %v530_v21  ;;  %v559_v1 = vand.u32 4294901760, %v1643_v42  ;;  %v2157_v20 = vand.u32 4294901760, %v1402_v28 }
  0x37   :  { %461 = vmatpush.msrb.mxu2 %v1507_v43  ;;  %251 = vmatpush.msra.mxu1 %v250_v37  ;;  %v553_v37 = vand.u32 4294901760, %v1631_v6  ;;  %v537_v21 = vand.u32 4294901760, %v536_v34  ;;  %v1678_v34 = vand.u32 4294901760, %v66_v18 }
  0x38   :  { %365 = vmatpush.msrb.mxu0 %v2154_v16  ;;  %520 = vmatpush.msrb.mxu3 %v519_v29  ;;  %v2155_v29 = vand.u32 4294901760, %v1386_v19  ;;  %v1666_v16 = vsub.f32 %v58_v36, %v1645_v40  ;;  %v543_v19 = vand.u32 4294901760, %v542_v7 }
  0x39   :  { %420 = vmatpush.msrb.mxu1 %v1357_v3  ;;  %463 = vmatpush.msrb.mxu2 %v1522_v60  ;;  %v548_v3 = vsub.f32 %v1618_v2, %v2140_v14  ;;  %v63_v14 = vld [vmem:[#allocation5 + $0x20] sm:$0xff] }
  0x3a   :  { %369 = vmatpush.msrb.mxu0 %v2155_v29  ;;  %526 = vmatpush.msrb.mxu3 %v525_v15  ;;  %v554_v15 = vsub.f32 %v1631_v6, %v553_v37  ;;  %v1692_v7 = vand.u32 4294901760, %v1666_v16 }
  0x3b   :  { %422 = vmatpush.msrb.mxu1 %v1359_v4  ;;  %465 = vmatpush.msrb.mxu2 %v1530_v0  ;;  %v1669_v4 = vsub.f32 %v72_v48, %v1640_v55  ;;  %v549_v36 = vand.u32 4294901760, %v548_v3  ;;  %v60_v48 = vld [vmem:[#allocation5 + $0x8] sm:$0xff]  ;;  %v1701_v3 = vsub.f32 %v66_v18, %v1678_v34 }
  0x3c   :  { %373 = vmatpush.msrb.mxu0 %v2156_v63  ;;  %532 = vmatpush.msrb.mxu3 %v531_v8  ;;  %v560_v63 = vsub.f32 %v1643_v42, %v559_v1  ;;  %v555_v28 = vand.u32 4294901760, %v554_v15  ;;  %v1703_v29 = vand.u32 4294901760, %v60_v48  ;;  %v150_v18 = vsub.f32 %v1666_v16, %v1692_v7 }
  0x3d   :  { %424 = vmatpush.msrb.mxu1 %v1361_v5  ;;  %467 = vmatpush.msrb.mxu2 %v1551_v51  ;;  %v1683_v5 = vsub.f32 %v69_v26, %v1660_v50  ;;  %v565_v8 = vand.u32 4294901760, %v1669_v4  ;;  %v2158_v26 = vand.u32 4294901760, %v1425_v39 }
  0x3e   :  { %377 = vmatpush.msrb.mxu0 %v2157_v20  ;;  %538 = vmatpush.msrb.mxu3 %v537_v21  ;;  %v561_v20 = vand.u32 4294901760, %v560_v63  ;;  %v1724_v15 = vsub.f32 %v60_v48, %v1703_v29 }
  0x3f   :  { %426 = vmatpush.msrb.mxu1 %v1363_v9  ;;  %469 = vmatpush.msrb.mxu2 %v1567_v27  ;;  %v1694_v9 = vand.u32 4294901760, %v63_v14  ;;  %v571_v21 = vand.u32 4294901760, %v1683_v5  ;;  %v566_v39 = vsub.f32 %v1669_v4, %v565_v8 }
  0x40   :  { %381 = vmatpush.msrb.mxu0 %v2158_v26  ;;  %544 = vmatpush.msrb.mxu3 %v543_v19  ;;  %v589_v48 = vand.u32 4294901760, %v1724_v15 }
  0x41   :  { %428 = vmatpush.msrb.mxu1 %v1365_v10  ;;  %471 = vmatpush.msrb.mxu2 %v1582_v22  ;;  %v2159_v10 = vand.u32 4294901760, %v1434_v44  ;;  %v1716_v19 = vsub.f32 %v63_v14, %v1694_v9  ;;  %v577_v44 = vand.u32 4294901760, %v1701_v3  ;;  %v572_v14 = vsub.f32 %v1683_v5, %v571_v21 }
  0x42   :  { %550 = vmatpush.msrb.mxu3 %v549_v36  ;;  %v1733_v36 = vand.u32 4294901760, %v150_v18  ;;  %307 = vmatmul.f32.vlgmr.msra.gmra.mxu2 %v1666_v16 }
  0x43   :  { %430 = vmatpush.msrb.mxu1 %v1367_v11  ;;  %473 = vmatpush.msrb.mxu2 %v1587_v59  ;;  %v2160_v11 = vand.u32 4294901760, %v1450_v52  ;;  %v567_v52 = vand.u32 4294901760, %v566_v39  ;;  %v583_v63 = vand.u32 4294901760, %v1716_v19  ;;  %v573_v26 = vand.u32 4294901760, %v572_v14  ;;  %v2168_v39 = vld [vmem:[#allocation12_spill] sm:$0xff]  ;;  %v82_v14 = vld [vmem:[#allocation5 + $0xb8] sm:$0xff] }
  0x44   :  { %385 = vmatpush.msrb.mxu0 %v2159_v10  ;;  %556 = vmatpush.msrb.mxu3 %v555_v28  ;;  %v590_v28 = vsub.f32 %v1724_v15, %v589_v48  ;;  %v2164_v10 = vand.u32 4294901760, %v1496_v35  ;;  %v2167_v35 = vand.u32 4294901760, %v1534_v25  ;;  %v2172_v25 = vld [vmem:[#allocation15_spill] sm:$0xff] }
  0x45   :  { %432 = vmatpush.msrb.mxu1 %v1380_v17  ;;  %475 = vmatpush.msrb.mxu2 %v1609_v38  ;;  %v2161_v17 = vand.u32 4294901760, %v1460_v57  ;;  %v578_v57 = vsub.f32 %v1701_v3, %v577_v44  ;;  %v2173_v18 = vand.u32 4294901760, %v2172_v25 }
  0x46   :  { %389 = vmatpush.msrb.mxu0 %v2160_v11  ;;  %562 = vmatpush.msrb.mxu3 %v561_v20  ;;  %v591_v20 = vand.u32 4294901760, %v590_v28 }
  0x47   :  { %434 = vmatpush.msrb.mxu1 %v1396_v24  ;;  %477 = vmatpush.msrb.mxu2 %v1621_v13  ;;  %v2162_v24 = vand.u32 4294901760, %v1467_v61  ;;  %v2163_v61 = vand.u32 4294901760, %v1488_v30  ;;  %v2165_v30 = vand.u32 4294901760, %v1512_v49 }
  0x48   :  { %393 = vmatpush.msrb.mxu0 %v2161_v17  ;;  %568 = vmatpush.msrb.mxu3 %v567_v52 }
  0x49   :  { %436 = vmatpush.msrb.mxu1 %v1417_v33  ;;  %479 = vmatpush.msrb.mxu2 %v1640_v55  ;;  %v584_v33 = vsub.f32 %v1716_v19, %v583_v63 }
  0x4a   :  { %397 = vmatpush.msrb.mxu0 %v2162_v24  ;;  %346 = vmatmul.f32.vlgmr.msra.gmra.mxu3 %v1692_v7 }
  0x4b   :  { %438 = vmatpush.msrb.mxu1 %v1436_v45  ;;  %481 = vmatpush.msrb.mxu2 %v1660_v50  ;;  %v579_v45 = vand.u32 4294901760, %v578_v57 }
  0x4c   :  { %152 = vmatmul.f32.vlgmr.msra.gmra.mxu0 %v1733_v36  ;;  %574 = vmatpush.msrb.mxu3 %v573_v26  ;;  %v1909_v26 = vand.u32 4294901760, %v82_v14 }
  0x4d   :  { %440 = vmatpush.msrb.mxu1 %v1438_v46  ;;  %401 = vmatpush.msrb.mxu0 %v2163_v61  ;;  %v585_v46 = vand.u32 4294901760, %v584_v33 }
  0x4e   :  { %483 = vmatpush.msrb.mxu2 %v1678_v34  ;;  %253 = vmatmul.f32.vlgmr.msra.gmra.mxu1 %v1645_v40 }
  0x4f   :  { %442 = vmatpush.msrb.mxu1 %v1442_v47  ;;  %405 = vmatpush.msrb.mxu0 %v2164_v10  ;;  %v2166_v47 = vand.u32 4294901760, %v1505_v41 }
  0x50   :  { %485 = vmatpush.msrb.mxu2 %v1694_v9  ;;  %580 = vmatpush.msrb.mxu3 %v579_v45 }
  0x51   :  { %444 = vmatpush.msrb.mxu1 %v1462_v58  ;;  %409 = vmatpush.msrb.mxu0 %v2165_v30  ;;  %v2169_v58 = vld [vmem:[#allocation14_spill] sm:$0xff] }
  0x52   :  { %487 = vmatpush.msrb.mxu2 %v1703_v29  ;;  %586 = vmatpush.msrb.mxu3 %v585_v46  ;;  %v2170_v49 = vand.u32 4294901760, %v2169_v58  ;;  %v73_v46 = vld [vmem:[#allocation5 + $0x70] sm:$0xff] }
  0x53   :  { %446 = vmatpush.msrb.mxu1 %v1469_v62  ;;  %413 = vmatpush.msrb.mxu0 %v2167_v35  ;;  %v2171_v62 = vld [vmem:[#allocation13_spill] sm:$0xff] }
  0x54   :  { %694 = vmatpush.msra.mxu2 %v2166_v47  ;;  %592 = vmatpush.msrb.mxu3 %v591_v20  ;;  %v1931_v20 = vsub.f32 %v82_v14, %v1909_v26 }
  0x55   :  { %448 = vmatpush.msrb.mxu1 %v2168_v39  ;;  %415 = vmatmul.f32.vlgmr.msrb.gmra.mxu0 %v1645_v40  ;;  %v70_v39 = vld [vmem:[#allocation5 + $0x58] sm:$0xff] }
  0x56   :  { %600 = vmatpush.msra.mxu0 %v1505_v41  ;;  %698 = vmatpush.msra.mxu2 %v2170_v49  ;;  %v2174_v41 = vld [vmem:[#allocation16_spill] sm:$0xff] }
  0x57   :  { %761 = vmatpush.msra.mxu3 %v1480_v12  ;;  %450 = vmatpush.msrb.mxu1 %v2171_v62  ;;  %v2175_v11 = vand.u32 4294901760, %v2174_v41 }
  0x58   :  { %452 = vmatmul.f32.vlgmr.msrb.gmra.mxu1 %v1645_v40  ;;  %603 = vmatpush.msra.mxu0 %v2169_v58 }
  0x59   :  { %653 = vmatpush.msra.mxu1 %v1480_v12  ;;  %702 = vmatpush.msra.mxu2 %v2173_v18  ;;  %v2176_v12 = vand.u32 4294901760, %v1559_v54 }
  0x5a   :  { %763 = vmatpush.msra.mxu3 %v1490_v31  ;;  %606 = vmatpush.msra.mxu0 %v2172_v25  ;;  %v1945_v25 = vand.u32 4294901760, %v73_v46 }
  0x5b   :  { %655 = vmatpush.msra.mxu1 %v1490_v31  ;;  %706 = vmatpush.msra.mxu2 %v2175_v11  ;;  %v2177_v31 = vand.u32 4294901760, %v1580_v23 }
  0x5c   :  { %765 = vmatpush.msra.mxu3 %v1507_v43  ;;  %609 = vmatpush.msra.mxu0 %v2174_v41  ;;  %v67_v41 = vld [vmem:[#allocation5 + $0x40] sm:$0xff] }
  0x5d   :  { %657 = vmatpush.msra.mxu1 %v1507_v43  ;;  %710 = vmatpush.msra.mxu2 %v2176_v12  ;;  %v2178_v43 = vand.u32 4294901760, %v1607_v56  ;;  %v888_v12 = vand.u32 4294901760, %v1931_v20 }
  0x5e   :  { %767 = vmatpush.msra.mxu3 %v1522_v60  ;;  %612 = vmatpush.msra.mxu0 %v1559_v54 }
  0x5f   :  { %659 = vmatpush.msra.mxu1 %v1522_v60  ;;  %714 = vmatpush.msra.mxu2 %v2177_v31  ;;  %v106_v60 = vld [vmem:[#allocation5 + $0x178] sm:$0xff] }
  0x60   :  { %769 = vmatpush.msra.mxu3 %v1530_v0  ;;  %615 = vmatpush.msra.mxu0 %v1580_v23  ;;  %v2179_v23 = vand.u32 4294901760, %v1618_v2 }
  0x61   :  { %661 = vmatpush.msra.mxu1 %v1530_v0  ;;  %718 = vmatpush.msra.mxu2 %v535_v32  ;;  %v103_v0 = vld [vmem:[#allocation5 + $0x160] sm:$0xff] }
  0x62   :  { %771 = vmatpush.msra.mxu3 %v1551_v51  ;;  %618 = vmatpush.msra.mxu0 %v1597_v53  ;;  %v1827_v54 = vand.u32 4294901760, %v103_v0  ;;  %v91_v32 = vld [vmem:[#allocation5 + $0x100] sm:$0xff] }
  0x63   :  { %663 = vmatpush.msra.mxu1 %v1551_v51  ;;  %722 = vmatpush.msra.mxu2 %v2178_v43  ;;  %v1820_v51 = vand.u32 4294901760, %v106_v60  ;;  %v1957_v43 = vand.u32 4294901760, %v70_v39 }
  0x64   :  { %773 = vmatpush.msra.mxu3 %v1567_v27  ;;  %621 = vmatpush.msra.mxu0 %v1607_v56  ;;  %v1844_v56 = vsub.f32 %v103_v0, %v1827_v54 }
  0x65   :  { %665 = vmatpush.msra.mxu1 %v1567_v27  ;;  %726 = vmatpush.msra.mxu2 %v2179_v23  ;;  %v100_v27 = vld [vmem:[#allocation5 + $0x148] sm:$0xff]  ;;  %v1979_v14 = vsub.f32 %v70_v39, %v1957_v43 }
  0x66   :  { %775 = vmatpush.msra.mxu3 %v1582_v22  ;;  %624 = vmatpush.msra.mxu0 %v1618_v2  ;;  %v1835_v2 = vsub.f32 %v106_v60, %v1820_v51  ;;  %v1837_v53 = vand.u32 4294901760, %v100_v27  ;;  %v64_v23 = vld [vmem:[#allocation5 + $0x28] sm:$0xff] }
  0x67   :  { %667 = vmatpush.msra.mxu1 %v1582_v22  ;;  %730 = vmatpush.msra.mxu2 %v553_v37  ;;  %v97_v22 = vld [vmem:[#allocation5 + $0x130] sm:$0xff]  ;;  %v88_v37 = vld [vmem:[#allocation5 + $0xe8] sm:$0xff] }
  0x68   :  { %777 = vmatpush.msra.mxu3 %v1587_v59  ;;  %627 = vmatpush.msra.mxu0 %v1631_v6  ;;  %v840_v6 = vand.u32 4294901760, %v1835_v2 }
  0x69   :  { %669 = vmatpush.msra.mxu1 %v1587_v59  ;;  %734 = vmatpush.msra.mxu2 %v559_v1  ;;  %v94_v59 = vld [vmem:[#allocation5 + $0x118] sm:$0xff]  ;;  %v846_v1 = vand.u32 4294901760, %v1844_v56 }
  0x6a   :  { %779 = vmatpush.msra.mxu3 %v1609_v38  ;;  %630 = vmatpush.msra.mxu0 %v1643_v42  ;;  %v1855_v42 = vsub.f32 %v100_v27, %v1837_v53 }
  0x6b   :  { %671 = vmatpush.msra.mxu1 %v1609_v38  ;;  %738 = vmatpush.msra.mxu2 %v565_v8  ;;  %v1846_v38 = vand.u32 4294901760, %v97_v22  ;;  %v85_v8 = vld [vmem:[#allocation5 + $0xd0] sm:$0xff] }
  0x6c   :  { %781 = vmatpush.msra.mxu3 %v1621_v13  ;;  %493 = vmatmul.f32.vlgmr.msrb.gmra.mxu2 %v1733_v36 }
  0x6d   :  { %633 = vmatpush.msra.mxu0 %v1669_v4  ;;  %673 = vmatpush.msra.mxu1 %v1621_v13  ;;  %v1857_v13 = vand.u32 4294901760, %v94_v59  ;;  %v1866_v4 = vsub.f32 %v97_v22, %v1846_v38  ;;  %v1967_v22 = vsub.f32 %v73_v46, %v1945_v25 }
  0x6e   :  { %742 = vmatpush.msra.mxu2 %v571_v21  ;;  %783 = vmatpush.msra.mxu3 %v1640_v55  ;;  %v852_v21 = vand.u32 4294901760, %v1855_v42 }
  0x6f   :  { %594 = vmatmul.f32.vlgmr.msrb.gmra.mxu3 %v1645_v40  ;;  %636 = vmatpush.msra.mxu0 %v1683_v5  ;;  %v1868_v5 = vand.u32 4294901760, %v91_v32  ;;  %v858_v17 = vand.u32 4294901760, %v1866_v4 }
  0x70   :  { %675 = vmatpush.msra.mxu1 %v1640_v55  ;;  %746 = vmatpush.msra.mxu2 %v577_v44  ;;  %v1873_v55 = vand.u32 4294901760, %v88_v37  ;;  %v1882_v44 = vsub.f32 %v94_v59, %v1857_v13  ;;  %v853_v57 = vsub.f32 %v1855_v42, %v852_v21  ;;  %v1969_v59 = vand.u32 4294901760, %v67_v41 }
  0x71   :  { %785 = vmatpush.msra.mxu3 %v1660_v50  ;;  %639 = vmatpush.msra.mxu0 %v1701_v3  ;;  %v841_v3 = vsub.f32 %v1835_v2, %v840_v6  ;;  %v1896_v52 = vsub.f32 %v91_v32, %v1868_v5  ;;  %v859_v61 = vsub.f32 %v1866_v4, %v858_v17 }
  0x72   :  { %677 = vmatpush.msra.mxu1 %v1660_v50  ;;  %750 = vmatpush.msra.mxu2 %v583_v63  ;;  %v1887_v50 = vand.u32 4294901760, %v85_v8  ;;  %v79_v63 = vld [vmem:[#allocation5 + $0xa0] sm:$0xff] }
  0x73   :  { %787 = vmatpush.msra.mxu3 %v1678_v34  ;;  %642 = vmatpush.msra.mxu0 %v1716_v19  ;;  %v847_v19 = vsub.f32 %v1844_v56, %v846_v1  ;;  %v842_v24 = vand.u32 4294901760, %v841_v3  ;;  %v870_v45 = vand.u32 4294901760, %v1896_v52  ;;  %v1921_v28 = vand.u32 4294901760, %v79_v63 }
  0x74   :  { %679 = vmatpush.msra.mxu1 %v1678_v34  ;;  %754 = vmatpush.msra.mxu2 %v589_v48  ;;  %v1901_v34 = vsub.f32 %v88_v37, %v1873_v55  ;;  %v864_v48 = vand.u32 4294901760, %v1882_v44  ;;  %v860_v58 = vand.u32 4294901760, %v859_v61  ;;  %v61_v37 = vld [vmem:[#allocation5 + $0x10] sm:$0xff] }
  0x75   :  { %789 = vmatpush.msra.mxu3 %v1694_v9  ;;  %756 = vmatmul.f32.vlgmr.msra.gmra.mxu2 %v1645_v40  ;;  %v848_v33 = vand.u32 4294901760, %v847_v19  ;;  %v871_v49 = vsub.f32 %v1896_v52, %v870_v45  ;;  %v1943_v62 = vsub.f32 %v79_v63, %v1921_v28  ;;  %v1981_v19 = vand.u32 4294901760, %v64_v23 }
  0x76   :  { %645 = vmatpush.msra.mxu0 %v1724_v15  ;;  %681 = vmatpush.msra.mxu1 %v1694_v9  ;;  %v1914_v9 = vsub.f32 %v85_v8, %v1887_v50  ;;  %v76_v15 = vld [vmem:[#allocation5 + $0x88] sm:$0xff]  ;;  %v876_v10 = vand.u32 4294901760, %v1901_v34  ;;  %v865_v30 = vsub.f32 %v1882_v44, %v864_v48  ;;  %v889_v8 = vsub.f32 %v1931_v20, %v888_v12 }
  0x77   :  { %791 = vmatpush.msra.mxu3 %v1703_v29  ;;  %648 = vmatmul.f32.vlgmr.msra.gmra.mxu0 %v1666_v16  ;;  %v1933_v47 = vand.u32 4294901760, %v76_v15  ;;  %v872_v0 = vand.u32 4294901760, %v871_v49  ;;  %v894_v27 = vand.u32 4294901760, %v1943_v62 }
  0x78   :  { %793 = vmatmul.f32.vlgmr.msra.gmra.mxu3 %v1645_v40  ;;  %798 = vmatpush.msrb.mxu0 %v1820_v51  ;;  %v882_v35 = vand.u32 4294901760, %v1914_v9  ;;  %v877_v18 = vsub.f32 %v1901_v34, %v876_v10  ;;  %v866_v11 = vand.u32 4294901760, %v865_v30  ;;  %v890_v61 = vand.u32 4294901760, %v889_v8 }
  0x79   :  { %683 = vmatpush.msra.mxu1 %v1703_v29  ;;  %941 = vmatpush.msrb.mxu2 %v1835_v2  ;;  %v854_v29 = vand.u32 4294901760, %v853_v57  ;;  %v1955_v31 = vsub.f32 %v76_v15, %v1933_v47  ;;  %v906_v57 = vand.u32 4294901760, %v1967_v22  ;;  %v1991_v15 = vsub.f32 %v67_v41, %v1969_v59 }
  0x7a   :  { %687 = vmatmul.f32.vlgmr.msra.gmra.mxu1 %v1692_v7  ;;  %800 = vmatpush.msrb.mxu0 %v1827_v54  ;;  %v883_v60 = vsub.f32 %v1914_v9, %v882_v35  ;;  %v878_v32 = vand.u32 4294901760, %v877_v18  ;;  %v2003_v30 = vsub.f32 %v64_v23, %v1981_v19 }
  0x7b   :  { %843 = vmatpush.msrb.mxu1 %v842_v24  ;;  %944 = vmatpush.msrb.mxu2 %v1844_v56  ;;  %v900_v3 = vand.u32 4294901760, %v1955_v31  ;;  %v895_v24 = vsub.f32 %v1943_v62, %v894_v27  ;;  %v918_v49 = vand.u32 4294901760, %v1991_v15 }
  0x7c   :  { %802 = vmatpush.msrb.mxu0 %v1837_v53  ;;  %994 = vmatpush.msrb.mxu3 %v1820_v51  ;;  %v884_v63 = vand.u32 4294901760, %v883_v60  ;;  %v924_v60 = vand.u32 4294901760, %v2003_v30 }
  0x7d   :  { %849 = vmatpush.msrb.mxu1 %v848_v33  ;;  %947 = vmatpush.msrb.mxu2 %v1855_v42  ;;  %v1993_v33 = vand.u32 4294901760, %v61_v37  ;;  %v901_v46 = vsub.f32 %v1955_v31, %v900_v3  ;;  %v896_v39 = vand.u32 4294901760, %v895_v24 }
  0x7e   :  { %804 = vmatpush.msrb.mxu0 %v1846_v38  ;;  %996 = vmatpush.msrb.mxu3 %v1827_v54  ;;  %v925_v8 = vsub.f32 %v2003_v30, %v924_v60 }
  0x7f   :  { %855 = vmatpush.msrb.mxu1 %v854_v29  ;;  %950 = vmatpush.msrb.mxu2 %v1866_v4  ;;  %v912_v29 = vand.u32 4294901760, %v1979_v14  ;;  %v2013_v18 = vsub.f32 %v61_v37, %v1993_v33  ;;  %v902_v41 = vand.u32 4294901760, %v901_v46 }
  0x80   :  { %806 = vmatpush.msrb.mxu0 %v1857_v13  ;;  %998 = vmatpush.msrb.mxu3 %v1837_v53 }
  0x81   :  { %861 = vmatpush.msrb.mxu1 %v860_v58  ;;  %953 = vmatpush.msrb.mxu2 %v1882_v44  ;;  %v907_v58 = vsub.f32 %v1967_v22, %v906_v57 }
  0x82   :  { %808 = vmatpush.msrb.mxu0 %v1868_v5  ;;  %1000 = vmatpush.msrb.mxu3 %v1846_v38 }
  0x83   :  { %867 = vmatpush.msrb.mxu1 %v866_v11  ;;  %956 = vmatpush.msrb.mxu2 %v1896_v52  ;;  %v913_v11 = vsub.f32 %v1979_v14, %v912_v29  ;;  %v908_v23 = vand.u32 4294901760, %v907_v58 }
  0x84   :  { %810 = vmatpush.msrb.mxu0 %v1873_v55  ;;  %1002 = vmatpush.msrb.mxu3 %v1857_v13 }
  0x85   :  { %873 = vmatpush.msrb.mxu1 %v872_v0  ;;  %959 = vmatpush.msrb.mxu2 %v1901_v34  ;;  %v919_v0 = vsub.f32 %v1991_v15, %v918_v49  ;;  %v914_v37 = vand.u32 4294901760, %v913_v11 }
  0x86   :  { %812 = vmatpush.msrb.mxu0 %v1887_v50  ;;  %1004 = vmatpush.msrb.mxu3 %v1868_v5 }
  0x87   :  { %879 = vmatpush.msrb.mxu1 %v878_v32  ;;  %962 = vmatpush.msrb.mxu2 %v1914_v9  ;;  %v930_v32 = vand.u32 4294901760, %v2013_v18 }
  0x88   :  { %814 = vmatpush.msrb.mxu0 %v1909_v26  ;;  %1006 = vmatpush.msrb.mxu3 %v1873_v55 }
  0x89   :  { %885 = vmatpush.msrb.mxu1 %v884_v63  ;;  %965 = vmatpush.msrb.mxu2 %v1931_v20  ;;  %v920_v63 = vand.u32 4294901760, %v919_v0  ;;  %v931_v24 = vsub.f32 %v2013_v18, %v930_v32 }
  0x8a   :  { %816 = vmatpush.msrb.mxu0 %v1921_v28  ;;  %1008 = vmatpush.msrb.mxu3 %v1887_v50 }
  0x8b   :  { %891 = vmatpush.msrb.mxu1 %v890_v61  ;;  %968 = vmatpush.msrb.mxu2 %v1943_v62  ;;  %v926_v61 = vand.u32 4294901760, %v925_v8  ;;  %v932_v46 = vand.u32 4294901760, %v931_v24 }
  0x8c   :  { %818 = vmatpush.msrb.mxu0 %v1933_v47  ;;  %1010 = vmatpush.msrb.mxu3 %v1909_v26 }
  0x8d   :  { %897 = vmatpush.msrb.mxu1 %v896_v39  ;;  %971 = vmatpush.msrb.mxu2 %v1955_v31 }
  0x8e   :  { %820 = vmatpush.msrb.mxu0 %v1945_v25  ;;  %1012 = vmatpush.msrb.mxu3 %v1921_v28 }
  0x8f   :  { %903 = vmatpush.msrb.mxu1 %v902_v41  ;;  %974 = vmatpush.msrb.mxu2 %v1967_v22 }
  0x90   :  { %822 = vmatpush.msrb.mxu0 %v1957_v43  ;;  %1014 = vmatpush.msrb.mxu3 %v1933_v47 }
  0x91   :  { %909 = vmatpush.msrb.mxu1 %v908_v23  ;;  %977 = vmatpush.msrb.mxu2 %v1979_v14 }
  0x92   :  { %824 = vmatpush.msrb.mxu0 %v1969_v59  ;;  %1016 = vmatpush.msrb.mxu3 %v1945_v25 }
  0x93   :  { %915 = vmatpush.msrb.mxu1 %v914_v37  ;;  %980 = vmatpush.msrb.mxu2 %v1991_v15 }
  0x94   :  { %826 = vmatpush.msrb.mxu0 %v1981_v19  ;;  %1018 = vmatpush.msrb.mxu3 %v1957_v43 }
  0x95   :  { %921 = vmatpush.msrb.mxu1 %v920_v63  ;;  %983 = vmatpush.msrb.mxu2 %v2003_v30 }
  0x96   :  { %828 = vmatpush.msrb.mxu0 %v1993_v33  ;;  %1020 = vmatpush.msrb.mxu3 %v1969_v59 }
  0x97   :  { %927 = vmatpush.msrb.mxu1 %v926_v61  ;;  %986 = vmatpush.msrb.mxu2 %v2013_v18 }
  0x98   :  { %1035 = vmatpush.msra.mxu0 %v840_v6  ;;  %1022 = vmatpush.msrb.mxu3 %v1981_v19 }
  0x99   :  { %933 = vmatpush.msrb.mxu1 %v932_v46  ;;  %989 = vmatmul.f32.vlgmr.msrb.gmra.mxu2 %v1666_v16  ;;  %v107_v16 = vld [vmem:[#allocation7] sm:$0x7] }
  0x9a   :  { %1039 = vmatpush.msra.mxu0 %v846_v1  ;;  %1024 = vmatpush.msrb.mxu3 %v1993_v33 }
  0x9b   :  { %1102 = vmatpush.msra.mxu1 %v1820_v51  ;;  %834 = vmatmul.f32.vlgmr.msrb.gmra.mxu0 %v1733_v36 }
  0x9c   :  { %1043 = vmatpush.msra.mxu0 %v852_v21  ;;  %1028 = vmatmul.f32.vlgmr.msrb.gmra.mxu3 %v1692_v7  ;;  %v109_v7 = vperm.slane %v107_v16, 0 }
  0x9d   :  { %1104 = vmatpush.msra.mxu1 %v1827_v54 }
  0x9e   :  { %1047 = vmatpush.msra.mxu0 %v858_v17  ;;  %935 = vmatmul.f32.vlgmr.msrb.gmra.mxu1 %v1645_v40 }
  0x9f   :  { %1106 = vmatpush.msra.mxu1 %v1837_v53 }
  0xa0   :  { %1051 = vmatpush.msra.mxu0 %v864_v48  ;;  %v110_v48 = vperm.slane %v107_v16, 1 }
  0xa1   :  { %1108 = vmatpush.msra.mxu1 %v1846_v38 }
  0xa2   :  { %1055 = vmatpush.msra.mxu0 %v870_v45 }
  0xa3   :  { %1110 = vmatpush.msra.mxu1 %v1857_v13 }
  0xa4   :  { %1059 = vmatpush.msra.mxu0 %v876_v10 }
  0xa5   :  { %1112 = vmatpush.msra.mxu1 %v1868_v5 }
  0xa6   :  { %1063 = vmatpush.msra.mxu0 %v882_v35 }
  0xa7   :  { %1114 = vmatpush.msra.mxu1 %v1873_v55 }
  0xa8   :  { %1067 = vmatpush.msra.mxu0 %v888_v12 }
  0xa9   :  { %1116 = vmatpush.msra.mxu1 %v1887_v50 }
  0xaa   :  { %1071 = vmatpush.msra.mxu0 %v894_v27 }
  0xab   :  { %1118 = vmatpush.msra.mxu1 %v1909_v26 }
  0xac   :  { %1075 = vmatpush.msra.mxu0 %v900_v3 }
  0xad   :  { %1120 = vmatpush.msra.mxu1 %v1921_v28 }
  0xae   :  { %1079 = vmatpush.msra.mxu0 %v906_v57 }
  0xaf   :  { %1122 = vmatpush.msra.mxu1 %v1933_v47 }
  0xb0   :  { %1083 = vmatpush.msra.mxu0 %v912_v29 }
  0xb1   :  { %1124 = vmatpush.msra.mxu1 %v1945_v25 }
  0xb2   :  { %1087 = vmatpush.msra.mxu0 %v918_v49 }
  0xb3   :  { %1126 = vmatpush.msra.mxu1 %v1957_v43 }
  0xb4   :  { %1091 = vmatpush.msra.mxu0 %v924_v60 }
  0xb5   :  { %1128 = vmatpush.msra.mxu1 %v1969_v59 }
  0xb6   :  { %1095 = vmatpush.msra.mxu0 %v930_v32 }
  0xb7   :  { %1130 = vmatpush.msra.mxu1 %v1981_v19  ;;  %1097 = vmatmul.f32.vlgmr.msra.gmra.mxu0 %v1645_v40 }
  0xb9   :  { %1132 = vmatpush.msra.mxu1 %v1993_v33 }
  0xba   :  { %1134 = vmatmul.f32.vlgmr.msra.gmra.mxu1 %v1645_v40  ;;  %v111_v40 = vperm.slane %v107_v16, 2 }
  0xc5   :  { %v308_v53 = vpop.f32.mrf.mxu2 }
  0xc9   :  { %v153_v36 = vpop.f32.mrf.mxu0 }
  0xca   :  { %v154_v51 = vadd.f32 %v153_v36, %v109_v7 }
  0xcb   :  { %v254_v54 = vpop.f32.mrf.mxu1 }
  0xcc   :  { %v255_v2 = vadd.f32 %v254_v54, %v154_v51 }
  0xcd   :  { %v347_v38 = vpop.f32.mrf.mxu3 }
  0xce   :  { %v309_v56 = vadd.f32 %v308_v53, %v255_v2 }
  0xd0   :  { %v348_v6 = vadd.f32 %v347_v38, %v309_v56 }
  0xd2   :  { %v416_v42 = vpop.f32.mrf.mxu0 }
  0xd3   :  { %v417_v13 = vadd.f32 %v416_v42, %v348_v6 }
  0xd5   :  { %v453_v1 = vpop.f32.mrf.mxu1 }
  0xd6   :  { %v454_v5 = vadd.f32 %v453_v1, %v417_v13 }
  0xd8   :  { %v1200_v44 = vmul.f32 -1.442695, %v454_v5 }
  0xda   :  { %1208 = vpow2.f32 %v1200_v44 }
  0xe0   :  { %v1209_v45 = vpop.eup %1208 }
  0xe1   :  { %v1141_v10 = vadd.f32 1.0, %v1209_v45 }
  0xe3   :  { %1210 = vrcp.f32 %v1141_v10  ;;  %vm1147_vm0 = vweird.f32 %v1141_v10  ;;  %v1153_v18 = vand.u32 2147483648, %v1141_v10  ;;  %v1151_v41 = vand.u32 2147483647, %v1141_v10 }
  0xe5   :  { %v1154_v23 = vor.u32 1.1754944e-38, %v1153_v18  ;;  %vm1152_vm3 = vcmp.eq.f32.partialorder %v1151_v41, 8.507059e+37 }
  0xe9   :  { %v1211_v43 = vpop.eup %1210 }
  0xea   :  { %v1143_v3 = vmul.f32 %v1211_v43, %v1141_v10  ;;  %vm1148_vm1 = vweird.f32 %v1211_v43 }
  0xeb   :  { %vm1149_vm2 = vmor %vm1147_vm0, %vm1148_vm1 }
  0xec   :  { %v1144_v33 = vsub.f32 1.0, %v1143_v3 }
  0xee   :  { %v1145_v30 = vmul.f32 %v1211_v43, %v1144_v33 }
  0xef   :  { %v494_v4 = vpop.f32.mrf.mxu2 }
  0xf0   :  { %v495_v20 = vadd.f32 %v494_v4, %v110_v48  ;;  %v1146_v58 = vadd.f32 %v1211_v43, %v1145_v30 }
  0xf2   :  { %v595_v21 = vpop.f32.mrf.mxu3  ;;  %v1150_v11 = vsel %vm1149_vm2, %v1211_v43, %v1146_v58 }
  0xf3   :  { %v596_v62 = vadd.f32 %v595_v21, %v495_v20  ;;  %v1155_v0 = vsel %vm1152_vm3, %v1154_v23, %v1150_v11 }
  0xf4   :  { %v649_v55 = vpop.f32.mrf.mxu0 }
  0xf5   :  { %v650_v31 = vadd.f32 %v649_v55, %v596_v62 }
  0xf7   :  { %v688_v50 = vpop.f32.mrf.mxu1 }
  0xf8   :  { %v757_v17 = vpop.f32.mrf.mxu2  ;;  %v689_v59 = vadd.f32 %v688_v50, %v650_v31 }
  0xfa   :  { %v758_v57 = vadd.f32 %v757_v17, %v689_v59 }
  0xfb   :  { %v794_v26 = vpop.f32.mrf.mxu3 }
  0xfc   :  { %v795_v29 = vadd.f32 %v794_v26, %v758_v57 }
 0x118   :  { %v835_v52 = vpop.f32.mrf.mxu0 }
 0x119   :  { %v836_v34 = vadd.f32 %v835_v52, %v111_v40 }
 0x11b   :  { %v936_v9 = vpop.f32.mrf.mxu1 }
 0x11c   :  { %v937_v28 = vadd.f32 %v936_v9, %v836_v34  ;;  %v990_v47 = vpop.f32.mrf.mxu2 }
 0x11e   :  { %v991_v35 = vadd.f32 %v990_v47, %v937_v28 }
 0x11f   :  { %v1029_v25 = vpop.f32.mrf.mxu3 }
 0x120   :  { %v1030_v12 = vadd.f32 %v1029_v25, %v991_v35 }
 0x134   :  { %v1098_v27 = vpop.f32.mrf.mxu0 }
 0x135   :  { %v1099_v22 = vadd.f32 %v1098_v27, %v1030_v12 }
 0x137   :  { %v1135_v14 = vpop.f32.mrf.mxu1 }
 0x138   :  { %v1136_v19 = vadd.f32 %v1135_v14, %v1099_v22 }
 0x13a   :  { %v1201_v15 = vmul.f32 -1.442695, %v1136_v19 }
 0x13c   :  { %1212 = vpow2.f32 %v1201_v15 }
 0x13d   :  { %1214 = vtanh.f32 %v795_v29 }
 0x142   :  { %v1213_v39 = vpop.eup %1212 }
 0x143   :  { %v1161_v49 = vadd.f32 1.0, %v1213_v39  ;;  %v1215_v60 = vpop.eup %1214 }
 0x144   :  { %v1177_v37 = vmul.f32 %v1215_v60, %v1155_v0 }
 0x145   :  { %1216 = vrcp.f32 %v1161_v49  ;;  %v1173_v24 = vand.u32 2147483648, %v1161_v49  ;;  %v1171_v46 = vand.u32 2147483647, %v1161_v49  ;;  %vm1167_vm5 = vweird.f32 %v1161_v49 }
 0x146   :  { %1218 = vtanh.f32 %v1177_v37 }
 0x147   :  { %v1174_v7 = vor.u32 1.1754944e-38, %v1173_v24  ;;  %vm1172_vm7 = vcmp.eq.f32.partialorder %v1171_v46, 8.507059e+37 }
 0x14b   :  { %v1217_v32 = vpop.eup %1216 }
 0x14c   :  { %v1163_v8 = vmul.f32 %v1217_v32, %v1161_v49  ;;  %vm1168_vm4 = vweird.f32 %v1217_v32  ;;  %v1219_v51 = vpop.eup %1218 }
 0x14d   :  { %vm1169_vm6 = vmor %vm1167_vm5, %vm1168_vm4 }
 0x14e   :  { %v1164_v63 = vsub.f32 1.0, %v1163_v8 }
 0x150   :  { %v1165_v61 = vmul.f32 %v1217_v32, %v1164_v63 }
 0x152   :  { %v1166_v16 = vadd.f32 %v1217_v32, %v1165_v61 }
 0x154   :  { %v1170_v36 = vsel %vm1169_vm6, %v1217_v32, %v1166_v16 }
 0x155   :  { %v1175_v54 = vsel %vm1172_vm7, %v1174_v7, %v1170_v36 }
 0x156   :  { %v1179_v2 = vmul.f32 %v1219_v51, %v1175_v54 }
 0x158   :  { %v1180_v53 = vmax.f32 %v1179_v2, 0.0 }
 0x15a   :  { %1181 = vst [vmem:[#allocation8] sm:$0xf] %v1180_v53 }
 0x15b   :  { %1192 = dma.vmem_to_hbm [thread:$0]  %s1188_s2, 64, %s1190_s30, [#allocation4]  }
 0x15c   :  { %1320 = dma.done.wait [#allocation4], 64  }
 0x15d   :  { %1321 = vsyncadd [#allocation4], 4294967232 }
 0x15e   :  { %1197 = vsyncpa [#allocation3], 1 }
 0x15f   :  { %1198 = vsyncpa [#allocation6], 1 }
 0x160   :  { %1199 = vsyncpa [#allocation4], 1 }

</bundles_post_ra>
